<compile_context>
chip_gen: v6e
topology: v6e:2x2x1
jax: 0.10.0
libtpu: 0.0.40
codegen_flags: <defaults>
</compile_context>

<pallas_src>
import jax
import jax.numpy as jnp
from jax.experimental import pallas as pl
from jax.experimental.pallas import tpu as pltpu


def vae_classifier_kernel(x_ref,
                          w_enc_ref, b_enc_ref,
                          w_hc_ref, b_hc_ref,
                          w_out_ref, b_out_ref,
                          out_ref):
    # x tile: [TILE_B, D_in] f32 -> bf16 for the MXU.
    x = x_ref[...].astype(jnp.bfloat16)

    # encoder: Linear(D_in, H) + ReLU  (bf16 inputs, f32 accumulate)
    h = jnp.dot(x, w_enc_ref[...], preferred_element_type=jnp.float32)
    h = jnp.maximum(h + b_enc_ref[...], 0.0)

    # fused (fc_mu ∘ classifier Linear1): Linear(H, 32) + ReLU
    c1 = jnp.dot(h.astype(jnp.bfloat16), w_hc_ref[...],
                 preferred_element_type=jnp.float32)
    c1 = jnp.maximum(c1 + b_hc_ref[...], 0.0)

    # classifier Linear2 (output padded to a lane-dense 128-wide slab)
    logits = jnp.dot(c1.astype(jnp.bfloat16), w_out_ref[...],
                     preferred_element_type=jnp.float32)
    out_ref[...] = logits + b_out_ref[...]


def vae_classifier_forward(x, params, *, tile_b=256):
    """x: [B, D_in] float32.  params: dict from init_params.  Returns [B, C] f32."""
    B, d_in = x.shape
    hidden = params["w_enc"].shape[1]
    clf_hidden = params["w_c1"].shape[1]
    num_classes = params["w_c2"].shape[1]

    # ---- algebraic fusion of fc_mu with classifier Linear1 (exact) ----------
    w_hc = params["w_mu"] @ params["w_c1"]                       # (H, 32)
    b_hc = params["b_mu"] @ params["w_c1"] + params["b_c1"]      # (1, 32)

    # ---- lane-dense output: pad classes to a multiple of 128 ----------------
    c_pad = 128 * ((num_classes + 127) // 128)
    w_out = jnp.zeros((clf_hidden, c_pad), jnp.float32).at[:, :num_classes].set(
        params["w_c2"])
    b_out = jnp.zeros((1, c_pad), jnp.float32).at[:, :num_classes].set(
        params["b_c2"])

    # ---- bf16 weights (cast once); biases stay f32 ---------------------------
    w_enc_bf = params["w_enc"].astype(jnp.bfloat16)
    w_hc_bf = w_hc.astype(jnp.bfloat16)
    w_out_bf = w_out.astype(jnp.bfloat16)

    # ---- batch tiling: TILE_B multiple of 8, pad batch to a whole grid -------
    b8 = 8 * ((B + 7) // 8)
    tb = min(tile_b, b8)
    tb = 8 * ((tb + 7) // 8)
    b_pad = tb * ((B + tb - 1) // tb)
    x_p = x if b_pad == B else jnp.pad(x, ((0, b_pad - B), (0, 0)))
    n_tiles = b_pad // tb

    flops = 2 * b_pad * (d_in * hidden + hidden * clf_hidden + clf_hidden * c_pad)
    bytes_accessed = (x_p.size * 4 + b_pad * c_pad * 4
                      + (w_enc_bf.size + w_hc_bf.size + w_out_bf.size) * 2
                      + (params["b_enc"].size + b_hc.size + b_out.size) * 4)

    const = lambda a: pl.BlockSpec(a.shape, lambda i: (0, 0))

    out = pl.pallas_call(
        vae_classifier_kernel,
        out_shape=jax.ShapeDtypeStruct((b_pad, c_pad), jnp.float32),
        grid_spec=pltpu.PrefetchScalarGridSpec(
            num_scalar_prefetch=0,
            grid=(n_tiles,),
            in_specs=[
                pl.BlockSpec((tb, d_in), lambda i: (i, 0)),   # x: batch-tiled
                const(w_enc_bf), const(params["b_enc"]),      # weights resident
                const(w_hc_bf), const(b_hc),
                const(w_out_bf), const(b_out),
            ],
            out_specs=pl.BlockSpec((tb, c_pad), lambda i: (i, 0)),
        ),
        compiler_params=pltpu.CompilerParams(
            dimension_semantics=("parallel",),        # megacore sharding on v7x
            vmem_limit_bytes=32 * 1024 * 1024,        # explicit, v7x-safe budget
        ),
        cost_estimate=pl.CostEstimate(
            flops=flops, transcendentals=0, bytes_accessed=bytes_accessed),
    )(x_p, w_enc_bf, params["b_enc"], w_hc_bf, b_hc, w_out_bf, b_out)

    return out[:B, :num_classes]


def init_params(key, d_in, hidden, latent, clf_hidden, num_classes):
    """Deterministic synthetic parameters; biases kept 2-D [1, out] for TPU layout."""
    ks = jax.random.split(key, 8)
    s = lambda fan_in: 1.0 / jnp.sqrt(jnp.float32(fan_in))
    return {
        "w_enc": jax.random.normal(ks[0], (d_in, hidden), jnp.float32) * s(d_in),
        "b_enc": jax.random.normal(ks[1], (1, hidden), jnp.float32) * 0.01,
        "w_mu":  jax.random.normal(ks[2], (hidden, latent), jnp.float32) * s(hidden),
        "b_mu":  jax.random.normal(ks[3], (1, latent), jnp.float32) * 0.01,
        "w_c1":  jax.random.normal(ks[4], (latent, clf_hidden), jnp.float32) * s(latent),
        "b_c1":  jax.random.normal(ks[5], (1, clf_hidden), jnp.float32) * 0.01,
        "w_c2":  jax.random.normal(ks[6], (clf_hidden, num_classes), jnp.float32) * s(clf_hidden),
        "b_c2":  jax.random.normal(ks[7], (1, num_classes), jnp.float32) * 0.01,
    }


def _ref_f32(x, p):
    """Original (unfused, f32) VAEClassifier forward semantics."""
    h = jnp.maximum(x @ p["w_enc"] + p["b_enc"], 0.0)
    mu = h @ p["w_mu"] + p["b_mu"]
    c1 = jnp.maximum(mu @ p["w_c1"] + p["b_c1"], 0.0)
    return c1 @ p["w_c2"] + p["b_c2"]


def _ref_kernel_path(x, p):
    """Pure-JAX replica of the exact kernel math (bf16 operands, fused fc_mu)."""
    w_enc = p["w_enc"].astype(jnp.bfloat16)
    w_hc = (p["w_mu"] @ p["w_c1"]).astype(jnp.bfloat16)
    b_hc = p["b_mu"] @ p["w_c1"] + p["b_c1"]
    w_c2 = p["w_c2"].astype(jnp.bfloat16)
    h = jnp.maximum(
        jnp.dot(x.astype(jnp.bfloat16), w_enc, preferred_element_type=jnp.float32)
        + p["b_enc"], 0.0)
    c1 = jnp.maximum(
        jnp.dot(h.astype(jnp.bfloat16), w_hc, preferred_element_type=jnp.float32)
        + b_hc, 0.0)
    return (jnp.dot(c1.astype(jnp.bfloat16), w_c2, preferred_element_type=jnp.float32)
            + p["b_c2"])


if __name__ == "__main__":
    key = jax.random.PRNGKey(0)
    k_x, k_p, k_x2 = jax.random.split(key, 3)

    B, D_IN, HIDDEN, LATENT, CLF_HIDDEN, NUM_CLASSES = 8, 16, 32, 16, 32, 4
    params = init_params(k_p, D_IN, HIDDEN, LATENT, CLF_HIDDEN, NUM_CLASSES)

    # --- small batch (single tile) -------------------------------------------
    x = jax.random.normal(k_x, (B, D_IN), jnp.float32)
    out = jax.block_until_ready(vae_classifier_forward(x, params))
    assert out.shape == (B, NUM_CLASSES)
    # Tight check vs. bit-matched (bf16 / fused) reference.
    assert jnp.allclose(out, _ref_kernel_path(x, params), atol=1e-4, rtol=1e-4)
    # Loose check vs. original f32 unfused semantics (bf16 rounding only).
    assert jnp.allclose(out, _ref_f32(x, params), atol=1e-1, rtol=1e-1)

    # --- larger ragged batch: exercises batch padding + multi-tile grid -------
    B2, TILE_B2 = 200, 64
    x2 = jax.random.normal(k_x2, (B2, D_IN), jnp.float32)
    out2 = jax.block_until_ready(vae_classifier_forward(x2, params, tile_b=TILE_B2))
    assert out2.shape == (B2, NUM_CLASSES)
    assert jnp.allclose(out2, _ref_kernel_path(x2, params), atol=1e-4, rtol=1e-4)
    assert jnp.allclose(out2, _ref_f32(x2, params), atol=1e-1, rtol=1e-1)

    print("KERNEL_OK")
</pallas_src>

<mosaic_0001>
module attributes {stable_mosaic.version = 11 : i64} {
  func.func @vae_classifier_kernel(%arg0: i32, %arg1: memref<8x16xf32, #tpu.memory_space<vmem>>, %arg2: memref<16x32xbf16, #tpu.memory_space<vmem>>, %arg3: memref<1x32xf32, #tpu.memory_space<vmem>>, %arg4: memref<32x32xbf16, #tpu.memory_space<vmem>>, %arg5: memref<1x32xf32, #tpu.memory_space<vmem>>, %arg6: memref<32x128xbf16, #tpu.memory_space<vmem>>, %arg7: memref<1x128xf32, #tpu.memory_space<vmem>>, %arg8: memref<8x128xf32, #tpu.memory_space<vmem>>) attributes {dimension_semantics = [#tpu.dimension_semantics<parallel>], iteration_bounds = array<i64: 1>, scalar_prefetch = 0 : i64, scratch_operands = 0 : i64, tpu.core_type = #tpu.core_type<tc>, window_params = [{transform_indices = @transform_0, window_bounds = array<i64: 8, 16>}, {pipeline_mode = #tpu.pipeline_mode<synchronous>, transform_indices = @transform_1, window_bounds = array<i64: 16, 32>}, {pipeline_mode = #tpu.pipeline_mode<synchronous>, transform_indices = @transform_2, window_bounds = array<i64: 1, 32>}, {pipeline_mode = #tpu.pipeline_mode<synchronous>, transform_indices = @transform_3, window_bounds = array<i64: 32, 32>}, {pipeline_mode = #tpu.pipeline_mode<synchronous>, transform_indices = @transform_4, window_bounds = array<i64: 1, 32>}, {pipeline_mode = #tpu.pipeline_mode<synchronous>, transform_indices = @transform_5, window_bounds = array<i64: 32, 128>}, {pipeline_mode = #tpu.pipeline_mode<synchronous>, transform_indices = @transform_6, window_bounds = array<i64: 1, 128>}, {transform_indices = @transform_7, window_bounds = array<i64: 8, 128>}]} {
    %c0 = arith.constant 0 : index
    %c0_0 = arith.constant 0 : index
    %0 = vector.load %arg1[%c0, %c0_0] : memref<8x16xf32, #tpu.memory_space<vmem>>, vector<8x16xf32>
    %1 = arith.truncf %0 : vector<8x16xf32> to vector<8x16xbf16>
    %c0_1 = arith.constant 0 : index
    %c0_2 = arith.constant 0 : index
    %2 = vector.load %arg2[%c0_1, %c0_2] : memref<16x32xbf16, #tpu.memory_space<vmem>>, vector<16x32xbf16>
    %cst = arith.constant dense<0.000000e+00> : vector<8x32xf32>
    %3 = tpu.matmul %1, %2, %cst {dimension_numbers = #tpu.dot_dimension_numbers<[1], [0], [0], [1], [0, 0, 1, 1], [], []>} : vector<8x16xbf16>, vector<16x32xbf16>, vector<8x32xf32> -> vector<8x32xf32>
    %c0_3 = arith.constant 0 : index
    %c0_4 = arith.constant 0 : index
    %4 = vector.load %arg3[%c0_3, %c0_4] : memref<1x32xf32, #tpu.memory_space<vmem>>, vector<1x32xf32>
    %5 = vector.broadcast %4 : vector<1x32xf32> to vector<8x32xf32>
    %6 = arith.addf %3, %5 : vector<8x32xf32>
    %cst_5 = arith.constant 0.000000e+00 : f32
    %7 = vector.broadcast %cst_5 : f32 to vector<8x32xf32>
    %8 = arith.maximumf %6, %7 : vector<8x32xf32>
    %9 = arith.truncf %8 : vector<8x32xf32> to vector<8x32xbf16>
    %c0_6 = arith.constant 0 : index
    %c0_7 = arith.constant 0 : index
    %10 = vector.load %arg4[%c0_6, %c0_7] : memref<32x32xbf16, #tpu.memory_space<vmem>>, vector<32x32xbf16>
    %cst_8 = arith.constant dense<0.000000e+00> : vector<8x32xf32>
    %11 = tpu.matmul %9, %10, %cst_8 {dimension_numbers = #tpu.dot_dimension_numbers<[1], [0], [0], [1], [0, 0, 1, 1], [], []>} : vector<8x32xbf16>, vector<32x32xbf16>, vector<8x32xf32> -> vector<8x32xf32>
    %c0_9 = arith.constant 0 : index
    %c0_10 = arith.constant 0 : index
    %12 = vector.load %arg5[%c0_9, %c0_10] : memref<1x32xf32, #tpu.memory_space<vmem>>, vector<1x32xf32>
    %13 = vector.broadcast %12 : vector<1x32xf32> to vector<8x32xf32>
    %14 = arith.addf %11, %13 : vector<8x32xf32>
    %cst_11 = arith.constant 0.000000e+00 : f32
    %15 = vector.broadcast %cst_11 : f32 to vector<8x32xf32>
    %16 = arith.maximumf %14, %15 : vector<8x32xf32>
    %17 = arith.truncf %16 : vector<8x32xf32> to vector<8x32xbf16>
    %c0_12 = arith.constant 0 : index
    %c0_13 = arith.constant 0 : index
    %18 = vector.load %arg6[%c0_12, %c0_13] : memref<32x128xbf16, #tpu.memory_space<vmem>>, vector<32x128xbf16>
    %cst_14 = arith.constant dense<0.000000e+00> : vector<8x128xf32>
    %19 = tpu.matmul %17, %18, %cst_14 {dimension_numbers = #tpu.dot_dimension_numbers<[1], [0], [0], [1], [0, 0, 1, 1], [], []>} : vector<8x32xbf16>, vector<32x128xbf16>, vector<8x128xf32> -> vector<8x128xf32>
    %c0_15 = arith.constant 0 : index
    %c0_16 = arith.constant 0 : index
    %20 = vector.load %arg7[%c0_15, %c0_16] : memref<1x128xf32, #tpu.memory_space<vmem>>, vector<1x128xf32>
    %21 = vector.broadcast %20 : vector<1x128xf32> to vector<8x128xf32>
    %22 = arith.addf %19, %21 : vector<8x128xf32>
    %c0_17 = arith.constant 0 : index
    %c0_18 = arith.constant 0 : index
    %23 = vector.load %arg8[%c0_17, %c0_18] : memref<8x128xf32, #tpu.memory_space<vmem>>, vector<8x128xf32>
    tpu.vector_store %arg8[%c0_17, %c0_18], %22 {strides = array<i32>} : memref<8x128xf32, #tpu.memory_space<vmem>>, vector<8x128xf32>,
    return
  }
  func.func @transform_0(%arg0: i32) -> (i32, i32) {
    %c0_i32 = arith.constant 0 : i32
    %c0_i32_0 = arith.constant 0 : i32
    return %arg0, %c0_i32 : i32, i32
  }
  func.func @transform_1(%arg0: i32) -> (i32, i32) {
    %c0_i32 = arith.constant 0 : i32
    %c0_i32_0 = arith.constant 0 : i32
    %c0_i32_1 = arith.constant 0 : i32
    return %c0_i32, %c0_i32_0 : i32, i32
  }
  func.func @transform_2(%arg0: i32) -> (i32, i32) {
    %c0_i32 = arith.constant 0 : i32
    %c0_i32_0 = arith.constant 0 : i32
    %c0_i32_1 = arith.constant 0 : i32
    return %c0_i32, %c0_i32_0 : i32, i32
  }
  func.func @transform_3(%arg0: i32) -> (i32, i32) {
    %c0_i32 = arith.constant 0 : i32
    %c0_i32_0 = arith.constant 0 : i32
    %c0_i32_1 = arith.constant 0 : i32
    return %c0_i32, %c0_i32_0 : i32, i32
  }
  func.func @transform_4(%arg0: i32) -> (i32, i32) {
    %c0_i32 = arith.constant 0 : i32
    %c0_i32_0 = arith.constant 0 : i32
    %c0_i32_1 = arith.constant 0 : i32
    return %c0_i32, %c0_i32_0 : i32, i32
  }
  func.func @transform_5(%arg0: i32) -> (i32, i32) {
    %c0_i32 = arith.constant 0 : i32
    %c0_i32_0 = arith.constant 0 : i32
    %c0_i32_1 = arith.constant 0 : i32
    return %c0_i32, %c0_i32_0 : i32, i32
  }
  func.func @transform_6(%arg0: i32) -> (i32, i32) {
    %c0_i32 = arith.constant 0 : i32
    %c0_i32_0 = arith.constant 0 : i32
    %c0_i32_1 = arith.constant 0 : i32
    return %c0_i32, %c0_i32_0 : i32, i32
  }
  func.func @transform_7(%arg0: i32) -> (i32, i32) {
    %c0_i32 = arith.constant 0 : i32
    %c0_i32_0 = arith.constant 0 : i32
    return %arg0, %c0_i32 : i32, i32
  }
}

</mosaic_0001>

<bundles_post_ra>
// kernel: tpu_custom_call.1
= control target key start
LH: loop header
LB: loop body
LE: loop exit
PB: predicated region body
PF: predicated region fallthrough
CT: control target
= control target key end

     0   :  { %12 = vsyncpa [#allocation3], 0  ;;  %s542_s0 = inlined_call_operand.hbm [shape: f32[8,16], index: 0, kind: input, shape index: {}]   ;;  %s543_s1 = inlined_call_operand.hbm [shape: bf16[16,32], index: 1, kind: input, shape index: {}]   ;;  %s544_s2 = inlined_call_operand.vmem [shape: f32[1,32], index: 2, kind: input, shape index: {}]   ;;  %s545_s3 = inlined_call_operand.hbm [shape: bf16[32,32], index: 3, kind: input, shape index: {}]   ;;  %s546_s4 = inlined_call_operand.vmem [shape: f32[1,32], index: 4, kind: input, shape index: {}]   ;;  %s547_s5 = inlined_call_operand.hbm [shape: bf16[32,128], index: 5, kind: input, shape index: {}]   ;;  %s548_s6 = inlined_call_operand.vmem [shape: f32[1,128], index: 6, kind: input, shape index: {}]   ;;  %s549_s7 = inlined_call_operand.hbm [shape: f32[8,128], index: 7, kind: output, shape index: {}]  }
   0x1   :  { %13 = vsyncpa [#allocation6], 0 }
   0x2   :  { %14 = vsyncpa [#allocation9], 0 }
   0x3   :  { %15 = vsyncpa [#allocation4], 0  ;;  %s460_s24 = smov [#allocation5]  }
   0x4   :  { %s31_s25 = sshll.u32 %s460_s24, 4  ;;  %s32_s25 = int_to_ptr.vmem [resolvable:$true] %s31_s25 }
   0x5   :  { %s360_s26 = scalar_lea.vmem %s32_s25, 128  ;;  %p365_p1 = scmp.lt.s32.totalorder %s32_s25, %s32_s25 }
   0x6   :  { %p361_p0 = scmp.ne.s32.totalorder %s32_s25, %s360_s26  ;;  %p366_p2 = scmp.lt.s32.totalorder %s360_s26, %s360_s26 }
   0x8   :  { %p367_p3 = por %p366_p2, %p365_p1 }
   0xa   :  { %p368_p4 = pnand %p367_p3, %p361_p0 }
   0xc   :  { %371 = shalt.err (!%p368_p4)
}
   0xd   :  { %s461_s27 = smov 64   ;;  %s462_s28 = smov 4  }
   0xe   :  { %37 = dma.hbm_to_vmem [thread:$0]  %s543_s1, 128, %s32_s25, [#allocation6], %s461_s27, %s461_s27, %s462_s28  }
   0xf   :  { %s463_s8 = smov [#allocation2]   ;;  %s464_s10 = smov [#allocation7]  }
  0x10   :  { %s22_s9 = sshll.u32 %s463_s8, 4  ;;  %s45_s11 = sshll.u32 %s464_s10, 4  ;;  %s23_s9 = int_to_ptr.vmem [resolvable:$true] %s22_s9  ;;  %s46_s11 = int_to_ptr.vmem [resolvable:$true] %s45_s11 }
  0x11   :  { %s380_s12 = scalar_lea.vmem %s23_s9, 128  ;;  %p385_p6 = scmp.lt.s32.totalorder %s23_s9, %s23_s9 }
  0x12   :  { %p381_p5 = scmp.ne.s32.totalorder %s23_s9, %s380_s12  ;;  %p386_p7 = scmp.lt.s32.totalorder %s380_s12, %s380_s12 }
  0x14   :  { %p387_p8 = por %p386_p7, %p385_p6 }
  0x16   :  { %p388_p9 = pnand %p387_p8, %p381_p5 }
  0x18   :  { %391 = shalt.err (!%p388_p9)
}
  0x19   :  { %25 = dma.hbm_to_vmem [thread:$0]  %s542_s0, 128, %s23_s9, [#allocation3]  }
  0x1a   :  { %s400_s15 = scalar_lea.vmem %s46_s11, 256  ;;  %p405_p11 = scmp.lt.s32.totalorder %s46_s11, %s46_s11 }
  0x1b   :  { %p401_p10 = scmp.ne.s32.totalorder %s46_s11, %s400_s15  ;;  %p406_p12 = scmp.lt.s32.totalorder %s400_s15, %s400_s15 }
  0x1d   :  { %p407_p13 = por %p406_p12, %p405_p11 }
  0x1f   :  { %p408_p0 = pnand %p407_p13, %p401_p10 }
  0x21   :  { %411 = shalt.err (!%p408_p0)
}
  0x22   :  { %51 = dma.hbm_to_vmem [thread:$0]  %s545_s3, 256, %s46_s11, [#allocation6], %s461_s27, %s461_s27, %s462_s28  }
  0x23   :  { %s465_s17 = smov [#allocation8]  }
  0x24   :  { %s59_s18 = sshll.u32 %s465_s17, 4  ;;  %s60_s18 = int_to_ptr.vmem [resolvable:$true] %s59_s18 }
  0x25   :  { %s420_s19 = scalar_lea.vmem %s60_s18, 256  ;;  %p425_p2 = scmp.lt.s32.totalorder %s60_s18, %s60_s18 }
  0x26   :  { %p421_p1 = scmp.ne.s32.totalorder %s60_s18, %s420_s19  ;;  %p426_p3 = scmp.lt.s32.totalorder %s420_s19, %s420_s19 }
  0x28   :  { %p427_p4 = por %p426_p3, %p425_p2 }
  0x2a   :  { %p428_p5 = pnand %p427_p4, %p421_p1 }
  0x2c   :  { %431 = shalt.err (!%p428_p5)
}
  0x2d   :  { %65 = dma.hbm_to_vmem [thread:$0]  %s547_s5, 256, %s60_s18, [#allocation9], %s461_s27, %s461_s27, %s462_s28  }
  0x2e   :  { %452 = dma.done.wait [#allocation3], 128  }
  0x2f   :  { %453 = vsyncadd [#allocation3], 4294967168 }
  0x30   :  { %454 = dma.done.wait [#allocation6], 384  }
  0x31   :  { %455 = vsyncadd [#allocation6], 4294966912 }
  0x32   :  { %456 = dma.done.wait [#allocation9], 256  }
  0x33   :  { %457 = vsyncadd [#allocation9], 4294967040  ;;  %v466_v0 = vmov 0.0   ;;  %vm467_vm0 = vmmov 0   ;;  %v347_v1 = vld [vmem:[#allocation5] sm:$0xff]   ;;  %v81_v2 = vld [vmem:[#allocation2] sm:$0xff] }
  0x34   :  { %316 = vmatprep.subr.bf16.mxu0 %v466_v0  ;;  %318 = vmatprep.mubr.msk.bf16.mxu0 %vm467_vm0, %v466_v0  ;;  %vm98_vm1 = vcmask 130048   ;;  %v82_v3 = vpack.c.bf16 %v81_v2, %v81_v2  ;;  %v348_v4 = vld [vmem:[#allocation7 + $0x8] sm:$0xff]   ;;  %v349_v5 = vld [vmem:[#allocation7] sm:$0xff]   ;;  %v350_v6 = vld [vmem:[#allocation8 + $0x8] sm:$0xff]   ;;  %vm167_vm2 = vcmask 261120   ;;  %s468_s24 = smov [#allocation10]  }
  0x35   :  { %322 = vmatprep.subr.bf16.mxu1 %v466_v0  ;;  %326 = vmatprep.mubr.msk.bf16.mxu1 %vm467_vm0, %v466_v0  ;;  %v297_v7 = vld [vmem:[%s544_s2] ss:$0 sm:$0xff]  ;;  %s286_s25 = sshll.u32 %s468_s24, 4  ;;  %s287_s25 = int_to_ptr.vmem [resolvable:$true] %s286_s25 }
  0x36   :  { %317 = vmatpush3.bf16.msra.mxu0 %v347_v1  ;;  %323 = vmatpush3.bf16.msra.mxu1 %v348_v4  ;;  %v351_v15 = vld [vmem:[#allocation8] sm:$0xff]   ;;  %p437_p7 = scmp.lt.s32.totalorder %s287_s25, %s287_s25 }
  0x37   :  { %330 = vmatprep.subr.bf16.mxu0 %v466_v0  ;;  %324 = vmatprep.subr.bf16.mxu1 %v466_v0  ;;  %v300_v16 = vld [vmem:[%s546_s4] ss:$0 sm:$0xff]  ;;  %s432_s4 = scalar_lea.vmem %s287_s25, 128 }
  0x38   :  { %v304_v24 = vld [vmem:[%s548_s6] ss:$0 sm:$0xff]  ;;  %p433_p6 = scmp.ne.s32.totalorder %s287_s25, %s432_s4  ;;  %p438_p8 = scmp.lt.s32.totalorder %s432_s4, %s432_s4 }
  0x39   :  { %319 = vmatmul.mubr.msk.bf16.vlgmr.msra.gmra.mxu0 %vm98_vm1, %v82_v3 }
  0x3a   :  { %334 = vmatprep.mubr.msk.bf16.mxu0 %vm467_vm0, %v466_v0  ;;  %325 = vmatpush3.bf16.msra.mxu1 %v349_v5  ;;  %p439_p9 = por %p438_p8, %p437_p7 }
  0x3b   :  { %331 = vmatpush3.bf16.msra.mxu0 %v350_v6 }
  0x3c   :  { %332 = vmatprep.subr.bf16.mxu0 %v466_v0  ;;  %p440_p10 = pnand %p439_p9, %p433_p6 }
  0x3f   :  { %333 = vmatpush3.bf16.msra.mxu0 %v351_v15 }
  0xf9   :  { %v136_v8 = vpop.f32.mrf.mxu0 }
  0xfa   :  { %v137_v9 = vadd.f32 %v297_v7, %v136_v8 }
  0xfb   :  { %v320_v10 = vpop.f32.mrf.mxu0 }
  0xfc   :  { %v142_v11 = vmax.f32 %v137_v9, 0.0 }
  0xfd   :  { %v139_v12 = vpop.f32.mrf.mxu0 }
  0xfe   :  { %v143_v13 = vpack.c.bf16 %v142_v11, %v142_v11 }
  0xff   :  { %v321_v14 = vpop.f32.mrf.mxu0 }
 0x100   :  { %327 = vmatmul.mubr.msk.bf16.vlgmr.msra.gmra.mxu1 %vm167_vm2, %v143_v13 }
 0x1c0   :  { %v205_v17 = vpop.f32.mrf.mxu1 }
 0x1c1   :  { %v206_v18 = vadd.f32 %v300_v16, %v205_v17 }
 0x1c2   :  { %v328_v19 = vpop.f32.mrf.mxu1 }
 0x1c3   :  { %v211_v20 = vmax.f32 %v206_v18, 0.0 }
 0x1c4   :  { %v208_v21 = vpop.f32.mrf.mxu1 }
 0x1c5   :  { %v212_v22 = vpack.c.bf16 %v211_v20, %v211_v20 }
 0x1c6   :  { %v329_v23 = vpop.f32.mrf.mxu1 }
 0x1c7   :  { %335 = vmatmul.mubr.msk.bf16.vlgmr.msra.gmra.mxu0 %vm167_vm2, %v212_v22 }
 0x287   :  { %v273_v25 = vpop.f32.mrf.mxu0 }
 0x288   :  { %v274_v26 = vadd.f32 %v304_v24, %v273_v25 }
 0x289   :  { %v336_v27 = vpop.f32.mrf.mxu0 }
 0x28a   :  { %279 = vst [vmem:[#allocation10] sm:$0xff] %v274_v26 }
 0x28b   :  { %v276_v28 = vpop.f32.mrf.mxu0 }
 0x28c   :  { %443 = shalt.err (!%p440_p10)
}
 0x28d   :  { %289 = dma.vmem_to_hbm [thread:$0]  %s287_s25, 128, %s549_s7, [#allocation4]   ;;  %v337_v29 = vpop.f32.mrf.mxu0 }
 0x28e   :  { %458 = dma.done.wait [#allocation4], 128  }
 0x28f   :  { %459 = vsyncadd [#allocation4], 4294967168 }
 0x290   :  { %293 = vsyncpa [#allocation3], 1 }
 0x291   :  { %294 = vsyncpa [#allocation6], 1 }
 0x292   :  { %295 = vsyncpa [#allocation9], 1 }
 0x293   :  { %296 = vsyncpa [#allocation4], 1 }

</bundles_post_ra>
